<compile_context>
chip_gen: v5e
topology: v5e:2x2
jax: 0.10.0
libtpu: 0.0.40
codegen_flags: <defaults>
</compile_context>

<pallas_src>
import jax
import jax.numpy as jnp
from jax.experimental import pallas as pl
from jax.experimental.pallas import tpu as pltpu


def linear_relu_kernel(x_ref, w_ref, b_ref, o_ref):
    # x_ref: (M, D_in) f32, w_ref: (D_in, D_out) f32, b_ref: (1, D_out) f32,
    # o_ref: (M, D_out) f32. Block shapes equal full array shapes -> no (8,128) issue.
    acc = jnp.dot(x_ref[...], w_ref[...], preferred_element_type=jnp.float32)  # MXU, f32
    acc = acc + b_ref[...]                                                      # broadcast bias (VPU)
    o_ref[...] = jnp.maximum(acc, 0.0).astype(o_ref.dtype)                      # ReLU


def my_module_dict_forward(x, w, b):
    """x: (B, S, D_in) f32, w: (D_in, D_out) f32, b: (D_out,) f32 -> (B, S, D_out) f32.

    Equivalent to the PyTorch ModuleDict forward: ReLU(Linear(x)).
    """
    B, S, D_in = x.shape
    D_out = w.shape[1]
    M = B * S

    x2d = x.reshape(M, D_in)          # free reshape (row-major collapse)
    b2d = b.reshape(1, D_out)

    itemsize = jnp.dtype(x.dtype).itemsize
    cost = pl.CostEstimate(
        flops=2 * M * D_in * D_out,
        transcendentals=0,
        bytes_accessed=(M * D_in + D_in * D_out + D_out + M * D_out) * itemsize,
    )

    vmem = pltpu.MemorySpace.VMEM
    out2d = pl.pallas_call(
        linear_relu_kernel,
        out_shape=jax.ShapeDtypeStruct((M, D_out), x.dtype),
        in_specs=[
            pl.BlockSpec((M, D_in), lambda: (0, 0), memory_space=vmem),
            pl.BlockSpec((D_in, D_out), lambda: (0, 0), memory_space=vmem),
            pl.BlockSpec((1, D_out), lambda: (0, 0), memory_space=vmem),
        ],
        out_specs=pl.BlockSpec((M, D_out), lambda: (0, 0), memory_space=vmem),
        cost_estimate=cost,
    )(x2d, w, b2d)

    return out2d.reshape(B, S, D_out)


if __name__ == "__main__":
    key = jax.random.PRNGKey(0)
    k_x, k_w, k_b = jax.random.split(key, 3)

    B, S, D_in, D_out = 8, 3, 32, 64

    # Deterministic PyTorch-style init: uniform(-1/sqrt(fan_in), 1/sqrt(fan_in)).
    bound = 1.0 / jnp.sqrt(jnp.float32(D_in))
    w = jax.random.uniform(k_w, (D_in, D_out), jnp.float32, -bound, bound)
    b = jax.random.uniform(k_b, (D_out,), jnp.float32, -bound, bound)

    x = jax.random.normal(k_x, (B, S, D_in), dtype=jnp.float32)

    out = my_module_dict_forward(x, w, b)
    jax.block_until_ready(out)

    # Reference in plain f32 JAX; f32 matmul in-kernel -> tight tolerance.
    ref = jnp.maximum(jnp.einsum("bsd,de->bse", x, w) + b, 0.0)
    assert out.shape == (B, S, D_out)
    assert out.dtype == jnp.float32
    assert jnp.allclose(out, ref, atol=1e-5, rtol=1e-5)

    print("KERNEL_OK")
</pallas_src>

<mosaic_0001>
module attributes {stable_mosaic.version = 11 : i64} {
  func.func @linear_relu_kernel(%arg0: memref<24x32xf32, #tpu.memory_space<vmem>>, %arg1: memref<32x64xf32, #tpu.memory_space<vmem>>, %arg2: memref<1x64xf32, #tpu.memory_space<vmem>>, %arg3: memref<24x64xf32, #tpu.memory_space<vmem>>) attributes {dimension_semantics = [], scalar_prefetch = 0 : i64, scratch_operands = 0 : i64, tpu.core_type = #tpu.core_type<tc>} {
    %c0 = arith.constant 0 : index
    %c0_0 = arith.constant 0 : index
    %0 = vector.load %arg0[%c0, %c0_0] : memref<24x32xf32, #tpu.memory_space<vmem>>, vector<24x32xf32>
    %c0_1 = arith.constant 0 : index
    %c0_2 = arith.constant 0 : index
    %1 = vector.load %arg1[%c0_1, %c0_2] : memref<32x64xf32, #tpu.memory_space<vmem>>, vector<32x64xf32>
    %cst = arith.constant dense<0.000000e+00> : vector<24x64xf32>
    %2 = tpu.matmul %0, %1, %cst {dimension_numbers = #tpu.dot_dimension_numbers<[1], [0], [0], [1], [0, 0, 1, 1], [], []>} : vector<24x32xf32>, vector<32x64xf32>, vector<24x64xf32> -> vector<24x64xf32>
    %c0_3 = arith.constant 0 : index
    %c0_4 = arith.constant 0 : index
    %3 = vector.load %arg2[%c0_3, %c0_4] : memref<1x64xf32, #tpu.memory_space<vmem>>, vector<1x64xf32>
    %4 = vector.broadcast %3 : vector<1x64xf32> to vector<24x64xf32>
    %5 = arith.addf %2, %4 : vector<24x64xf32>
    %cst_5 = arith.constant 0.000000e+00 : f32
    %6 = vector.broadcast %cst_5 : f32 to vector<24x64xf32>
    %7 = arith.maximumf %5, %6 : vector<24x64xf32>
    %c0_6 = arith.constant 0 : index
    %c0_7 = arith.constant 0 : index
    %8 = vector.load %arg3[%c0_6, %c0_7] : memref<24x64xf32, #tpu.memory_space<vmem>>, vector<24x64xf32>
    tpu.vector_store %arg3[%c0_6, %c0_7], %7 {strides = array<i32>} : memref<24x64xf32, #tpu.memory_space<vmem>>, vector<24x64xf32>,
    return
  }
}

</mosaic_0001>

<bundles_post_ra>
// kernel: tpu_custom_call.1
= control target key start
LH: loop header
LB: loop body
LE: loop exit
PB: predicated region body
PF: predicated region fallthrough
CT: control target
= control target key end

     0   :  { %8 = vsyncpa [#allocation3], 0  ;;  %s262_s0 = inlined_call_operand.hbm [shape: f32[24,32], index: 0, kind: input, shape index: {}]   ;;  %s263_s1 = inlined_call_operand.hbm [shape: f32[32,64], index: 1, kind: input, shape index: {}]   ;;  %s264_s2 = inlined_call_operand.vmem [shape: f32[1,64], index: 2, kind: input, shape index: {}]   ;;  %s265_s3 = inlined_call_operand.hbm [shape: f32[24,64], index: 3, kind: output, shape index: {}]  }
   0x1   :  { %9 = vsyncpa [#allocation6], 0 }
   0x2   :  { %10 = vsyncpa [#allocation4], 0  ;;  %s15_s14 = sshll.u32 %s262_s0, 4  ;;  %s216_s15 = smov [#allocation2]   ;;  %s16_s14 = int_to_ptr.hbm [resolvable:$true] %s15_s14 }
   0x3   :  { %s17_s16 = sshll.u32 %s216_s15, 4  ;;  %s28_s19 = sshll.u32 %s263_s1, 4  ;;  %s18_s16 = int_to_ptr.vmem [resolvable:$true] %s17_s16  ;;  %s29_s19 = int_to_ptr.hbm [resolvable:$true] %s28_s19 }
   0x4   :  { %s217_s20 = smov 128   ;;  %s218_s21 = smov 8  }
   0x5   :  { %23 = dma.hbm_to_vmem [thread:$0]  %s16_s14, 384, %s18_s16, [#allocation3], %s217_s20, %s217_s20, %s218_s21  }
   0x6   :  { %s219_s22 = smov [#allocation5]  }
   0x7   :  { %s30_s23 = sshll.u32 %s219_s22, 4  ;;  %s31_s23 = int_to_ptr.vmem [resolvable:$true] %s30_s23 }
   0x8   :  { %36 = dma.hbm_to_vmem [thread:$0]  %s29_s19, 512, %s31_s23, [#allocation6], %s217_s20, %s217_s20, %s218_s21  }
   0x9   :  { %210 = dma.done.wait [#allocation3], 384  }
   0xa   :  { %211 = vsyncadd [#allocation3], 4294966912 }
   0xb   :  { %212 = dma.done.wait [#allocation6], 512  }
   0xc   :  { %213 = vsyncadd [#allocation6], 4294966784  ;;  %v53_v0 = vld [vmem:[#allocation5 + $0x18] sm:$0xff]  ;;  %v52_v1 = vld [vmem:[#allocation5 + $0x10] sm:$0xff]  ;;  %vm58_vm0 = vcmask 261120   ;;  %vm97_vm1 = vcmask 523264  }
   0xd   :  { %125 = vmatpush.msra.mxu2 %v53_v0  ;;  %80 = vmatpush.msra.mxu0 %v53_v0  ;;  %v51_v2 = vld [vmem:[#allocation5 + $0x8] sm:$0xff]  ;;  %v50_v3 = vld [vmem:[#allocation5] sm:$0xff]  ;;  %v49_v4 = vld [vmem:[#allocation2 + $0x10] sm:$0xff]  ;;  %s220_s24 = smov [#allocation7]   ;;  %s107_s28 = sshll.u32 %s265_s3, 4  ;;  %s108_s28 = int_to_ptr.hbm [resolvable:$true] %s107_s28 }
   0xe   :  { %124 = vmatpush.msra.mxu1 %v53_v0  ;;  %v47_v5 = vld [vmem:[#allocation2] sm:$0xff]  ;;  %v48_v6 = vld [vmem:[#allocation2 + $0x8] sm:$0xff]  ;;  %s105_s25 = sshll.u32 %s220_s24, 4  ;;  %s106_s25 = int_to_ptr.vmem [resolvable:$true] %s105_s25 }
   0xf   :  { %127 = vmatpush.msra.mxu2 %v52_v1  ;;  %81 = vmatpush.msra.mxu0 %v52_v1  ;;  %v137_v7 = vld [vmem:[%s264_s2] ss:$0 sm:$0xff] }
  0x10   :  { %126 = vmatpush.msra.mxu1 %v52_v1 }
  0x11   :  { %129 = vmatpush.msra.mxu2 %v51_v2  ;;  %82 = vmatpush.msra.mxu0 %v51_v2 }
  0x12   :  { %128 = vmatpush.msra.mxu1 %v51_v2 }
  0x13   :  { %131 = vmatpush.msra.mxu2 %v50_v3  ;;  %83 = vmatpush.msra.mxu0 %v50_v3 }
  0x14   :  { %123 = vmatmul.msk.f32.vlgmr.msra.gmra.mxu2 %vm58_vm0, %v49_v4  ;;  %130 = vmatpush.msra.mxu1 %v50_v3 }
  0x15   :  { %121 = vmatmul.msk.f32.vlgmr.msra.gmra.mxu0 %vm58_vm0, %v47_v5  ;;  %122 = vmatmul.msk.f32.vlgmr.msra.gmra.mxu1 %vm58_vm0, %v48_v6 }
  0x92   :  { %v85_v8 = vpop.f32.mrf.mxu0  ;;  %v88_v9 = vpop.f32.mrf.mxu1 }
  0x93   :  { %v86_v10 = vadd.f32 %v137_v7, %v85_v8  ;;  %v89_v11 = vadd.f32 %v137_v7, %v88_v9 }
  0x95   :  { %v94_v12 = vmax.f32 %v86_v10, 0.0  ;;  %v95_v13 = vmax.f32 %v89_v11, 0.0 }
  0x97   :  { %98 = vst.msk [vmem:[#allocation7] sm:$0xff] %vm97_vm1, %v94_v12  ;;  %v91_v14 = vpop.f32.mrf.mxu2 }
  0x98   :  { %99 = vst.msk [vmem:[#allocation7 + $0x8] sm:$0xff] %vm97_vm1, %v95_v13  ;;  %v92_v15 = vadd.f32 %v137_v7, %v91_v14 }
  0x9a   :  { %v96_v16 = vmax.f32 %v92_v15, 0.0 }
  0x9c   :  { %100 = vst.msk [vmem:[#allocation7 + $0x10] sm:$0xff] %vm97_vm1, %v96_v16 }
  0x9d   :  { %113 = dma.vmem_to_hbm [thread:$0]  %s106_s25, 384, %s108_s28, [#allocation4], %s217_s20, %s217_s20, %s218_s21  }
  0x9e   :  { %214 = dma.done.wait [#allocation4], 384  }
  0x9f   :  { %215 = vsyncadd [#allocation4], 4294966912 }
  0xa0   :  { %118 = vsyncpa [#allocation3], 1 }
  0xa1   :  { %119 = vsyncpa [#allocation6], 1 }
  0xa2   :  { %120 = vsyncpa [#allocation4], 1 }

</bundles_post_ra>
